<compile_context>
chip_gen: v7x
topology: tpu7x:2x2x1
jax: 0.10.0
libtpu: 0.0.40
codegen_flags: <defaults>
</compile_context>

<pallas_src>
import functools

import jax
import jax.numpy as jnp
from jax.experimental import pallas as pl
from jax.experimental.pallas import tpu as pltpu

INPUT_SIZE = 3
HIDDEN_SIZE = 4
OUTPUT_SIZE = 3
BATCH = 100  # matches the torch script's x = torch.randn(100, input_size)
LANE = 128


def mlp_kernel(x_ref, w1_ref, b1_ref, w2_ref, b2_ref, o_ref):
    # x_ref : (IN, Npad)  VMEM, batch on lanes (lane-dense)
    # w1_ref: (HID, IN)   SMEM (PyTorch layout), b1_ref: (HID,) SMEM
    # w2_ref: (OUT, HID)  SMEM (PyTorch layout), b2_ref: (OUT,) SMEM
    # o_ref : (OUT, Npad) VMEM

    # Single load of x; rows are cheap sublane slices of the loaded value.
    xv = x_ref[...]
    xr = [xv[k:k + 1, :] for k in range(INPUT_SIZE)]

    # fc1 + ReLU: h_j = relu(sum_k W1[j,k] * x_k + b1[j])  -- pure VPU FMAs,
    # bias folded into the first multiply.
    hr = []
    for j in range(HIDDEN_SIZE):
        acc = xr[0] * w1_ref[j, 0] + b1_ref[j]
        for k in range(1, INPUT_SIZE):
            acc = acc + xr[k] * w1_ref[j, k]
        hr.append(jnp.maximum(acc, 0.0))

    # fc2: logits_i = sum_j W2[i,j] * h_j + b2[i]
    lr = []
    for i in range(OUTPUT_SIZE):
        acc = hr[0] * w2_ref[i, 0] + b2_ref[i]
        for j in range(1, HIDDEN_SIZE):
            acc = acc + hr[j] * w2_ref[i, j]
        lr.append(acc)

    # Softmax over the OUTPUT_SIZE feature rows (sublane axis): unrolled VPU
    # max / exp / add chain, no cross-lane (XLU) reduction.
    m = functools.reduce(jnp.maximum, lr)
    e = [jnp.exp(l - m) for l in lr]
    denom = functools.reduce(lambda a, b: a + b, e)
    inv = pl.reciprocal(denom, approx=False)  # exact: keeps 1e-5 tolerance

    # Coalesced store: one full (OUT, Npad) lane-dense write instead of three
    # sublane-masked row stores.
    probs = jnp.concatenate([e[i] * inv for i in range(OUTPUT_SIZE)], axis=0)
    o_ref[...] = probs


@jax.jit
def simple_model_forward(x, w1, b1, w2, b2):
    """x: (N, IN) float32; weights in PyTorch layout: w1 (HID, IN), w2 (OUT, HID)."""
    n = x.shape[0]
    n_pad = ((n + LANE - 1) // LANE) * LANE  # lane-align the batch

    # Transposed, lane-dense layout (IN, Npad). Zero-padded columns compute a
    # bias-only softmax (finite) and are sliced off below. The pad/transpose is
    # inside the jit and allowed to fuse into the pallas_call input.
    xt = jnp.zeros((INPUT_SIZE, n_pad), jnp.float32).at[:, :n].set(x.T)

    out_t = pl.pallas_call(
        mlp_kernel,
        out_shape=jax.ShapeDtypeStruct((OUTPUT_SIZE, n_pad), jnp.float32),
        in_specs=[
            pl.BlockSpec(memory_space=pltpu.MemorySpace.VMEM),  # x (IN, Npad)
            pl.BlockSpec(memory_space=pltpu.MemorySpace.SMEM),  # w1
            pl.BlockSpec(memory_space=pltpu.MemorySpace.SMEM),  # b1
            pl.BlockSpec(memory_space=pltpu.MemorySpace.SMEM),  # w2
            pl.BlockSpec(memory_space=pltpu.MemorySpace.SMEM),  # b2
        ],
        out_specs=pl.BlockSpec(memory_space=pltpu.MemorySpace.VMEM),
        compiler_params=pltpu.CompilerParams(
            # Let XLA fuse the pad/transpose producer into operand 0 (x) rather
            # than materializing xt in HBM. Scalar SMEM operands stay unfused.
            allow_input_fusion=[True, False, False, False, False]),
    )(xt, w1, b1, w2, b2)

    # Slice off padding and return PyTorch (N, OUT) layout; still inside the jit.
    return out_t[:, :n].T


def init_params(key):
    # PyTorch-style uniform(-1/sqrt(fan_in), +1/sqrt(fan_in)), PyTorch layout
    # (out_features, in_features) — exactly what the transposed kernel wants.
    k1, k2, k3, k4 = jax.random.split(key, 4)
    lim1 = 1.0 / jnp.sqrt(jnp.float32(INPUT_SIZE))
    lim2 = 1.0 / jnp.sqrt(jnp.float32(HIDDEN_SIZE))
    w1 = jax.random.uniform(k1, (HIDDEN_SIZE, INPUT_SIZE), jnp.float32, -lim1, lim1)
    b1 = jax.random.uniform(k2, (HIDDEN_SIZE,), jnp.float32, -lim1, lim1)
    w2 = jax.random.uniform(k3, (OUTPUT_SIZE, HIDDEN_SIZE), jnp.float32, -lim2, lim2)
    b2 = jax.random.uniform(k4, (OUTPUT_SIZE,), jnp.float32, -lim2, lim2)
    return w1, b1, w2, b2


def reference_forward(x, w1, b1, w2, b2):
    h = jnp.maximum(x @ w1.T + b1, 0.0)
    logits = h @ w2.T + b2
    return jax.nn.softmax(logits, axis=1)


if __name__ == "__main__":
    key = jax.random.PRNGKey(0)
    kx, kp = jax.random.split(key)
    x = jax.random.normal(kx, (BATCH, INPUT_SIZE), dtype=jnp.float32)
    w1, b1, w2, b2 = init_params(kp)

    out = simple_model_forward(x, w1, b1, w2, b2)
    out = jax.block_until_ready(out)

    ref = reference_forward(x, w1, b1, w2, b2)
    assert out.shape == (BATCH, OUTPUT_SIZE)
    assert jnp.allclose(jnp.sum(out, axis=1), 1.0, atol=1e-5)
    assert jnp.allclose(out, ref, atol=1e-5, rtol=1e-5)
    print("KERNEL_OK")
</pallas_src>

<mosaic_0001>
module attributes {stable_mosaic.version = 11 : i64} {
  func.func @mlp_kernel(%arg0: memref<3x128xf32, #tpu.memory_space<vmem>>, %arg1: memref<4x3xf32, #tpu.memory_space<smem>>, %arg2: memref<4xf32, #tpu.memory_space<smem>>, %arg3: memref<3x4xf32, #tpu.memory_space<smem>>, %arg4: memref<3xf32, #tpu.memory_space<smem>>, %arg5: memref<3x128xf32, #tpu.memory_space<vmem>>) attributes {dimension_semantics = [], scalar_prefetch = 0 : i64, scratch_operands = 0 : i64, tpu.core_type = #tpu.core_type<tc>} {
    %c0 = arith.constant 0 : index
    %c0_0 = arith.constant 0 : index
    %0 = vector.load %arg0[%c0, %c0_0] : memref<3x128xf32, #tpu.memory_space<vmem>>, vector<3x128xf32>
    %1 = vector.extract_strided_slice %0 {offsets = [0, 0], sizes = [1, 128], strides = [1, 1]} : vector<3x128xf32> to vector<1x128xf32>
    %2 = vector.extract_strided_slice %0 {offsets = [1, 0], sizes = [1, 128], strides = [1, 1]} : vector<3x128xf32> to vector<1x128xf32>
    %3 = vector.extract_strided_slice %0 {offsets = [2, 0], sizes = [1, 128], strides = [1, 1]} : vector<3x128xf32> to vector<1x128xf32>
    %c0_1 = arith.constant 0 : index
    %c0_2 = arith.constant 0 : index
    %4 = memref.load %arg1[%c0_1, %c0_2] : memref<4x3xf32, #tpu.memory_space<smem>>
    %5 = vector.broadcast %4 : f32 to vector<1x128xf32>
    %6 = arith.mulf %1, %5 : vector<1x128xf32>
    %c0_3 = arith.constant 0 : index
    %7 = memref.load %arg2[%c0_3] : memref<4xf32, #tpu.memory_space<smem>>
    %8 = vector.broadcast %7 : f32 to vector<1x128xf32>
    %9 = arith.addf %6, %8 : vector<1x128xf32>
    %c0_4 = arith.constant 0 : index
    %c1 = arith.constant 1 : index
    %10 = memref.load %arg1[%c0_4, %c1] : memref<4x3xf32, #tpu.memory_space<smem>>
    %11 = vector.broadcast %10 : f32 to vector<1x128xf32>
    %12 = arith.mulf %2, %11 : vector<1x128xf32>
    %13 = arith.addf %9, %12 : vector<1x128xf32>
    %c0_5 = arith.constant 0 : index
    %c2 = arith.constant 2 : index
    %14 = memref.load %arg1[%c0_5, %c2] : memref<4x3xf32, #tpu.memory_space<smem>>
    %15 = vector.broadcast %14 : f32 to vector<1x128xf32>
    %16 = arith.mulf %3, %15 : vector<1x128xf32>
    %17 = arith.addf %13, %16 : vector<1x128xf32>
    %cst = arith.constant 0.000000e+00 : f32
    %18 = vector.broadcast %cst : f32 to vector<1x128xf32>
    %19 = arith.maximumf %17, %18 : vector<1x128xf32>
    %c1_6 = arith.constant 1 : index
    %c0_7 = arith.constant 0 : index
    %20 = memref.load %arg1[%c1_6, %c0_7] : memref<4x3xf32, #tpu.memory_space<smem>>
    %21 = vector.broadcast %20 : f32 to vector<1x128xf32>
    %22 = arith.mulf %1, %21 : vector<1x128xf32>
    %c1_8 = arith.constant 1 : index
    %23 = memref.load %arg2[%c1_8] : memref<4xf32, #tpu.memory_space<smem>>
    %24 = vector.broadcast %23 : f32 to vector<1x128xf32>
    %25 = arith.addf %22, %24 : vector<1x128xf32>
    %c1_9 = arith.constant 1 : index
    %c1_10 = arith.constant 1 : index
    %26 = memref.load %arg1[%c1_9, %c1_10] : memref<4x3xf32, #tpu.memory_space<smem>>
    %27 = vector.broadcast %26 : f32 to vector<1x128xf32>
    %28 = arith.mulf %2, %27 : vector<1x128xf32>
    %29 = arith.addf %25, %28 : vector<1x128xf32>
    %c1_11 = arith.constant 1 : index
    %c2_12 = arith.constant 2 : index
    %30 = memref.load %arg1[%c1_11, %c2_12] : memref<4x3xf32, #tpu.memory_space<smem>>
    %31 = vector.broadcast %30 : f32 to vector<1x128xf32>
    %32 = arith.mulf %3, %31 : vector<1x128xf32>
    %33 = arith.addf %29, %32 : vector<1x128xf32>
    %cst_13 = arith.constant 0.000000e+00 : f32
    %34 = vector.broadcast %cst_13 : f32 to vector<1x128xf32>
    %35 = arith.maximumf %33, %34 : vector<1x128xf32>
    %c2_14 = arith.constant 2 : index
    %c0_15 = arith.constant 0 : index
    %36 = memref.load %arg1[%c2_14, %c0_15] : memref<4x3xf32, #tpu.memory_space<smem>>
    %37 = vector.broadcast %36 : f32 to vector<1x128xf32>
    %38 = arith.mulf %1, %37 : vector<1x128xf32>
    %c2_16 = arith.constant 2 : index
    %39 = memref.load %arg2[%c2_16] : memref<4xf32, #tpu.memory_space<smem>>
    %40 = vector.broadcast %39 : f32 to vector<1x128xf32>
    %41 = arith.addf %38, %40 : vector<1x128xf32>
    %c2_17 = arith.constant 2 : index
    %c1_18 = arith.constant 1 : index
    %42 = memref.load %arg1[%c2_17, %c1_18] : memref<4x3xf32, #tpu.memory_space<smem>>
    %43 = vector.broadcast %42 : f32 to vector<1x128xf32>
    %44 = arith.mulf %2, %43 : vector<1x128xf32>
    %45 = arith.addf %41, %44 : vector<1x128xf32>
    %c2_19 = arith.constant 2 : index
    %c2_20 = arith.constant 2 : index
    %46 = memref.load %arg1[%c2_19, %c2_20] : memref<4x3xf32, #tpu.memory_space<smem>>
    %47 = vector.broadcast %46 : f32 to vector<1x128xf32>
    %48 = arith.mulf %3, %47 : vector<1x128xf32>
    %49 = arith.addf %45, %48 : vector<1x128xf32>
    %cst_21 = arith.constant 0.000000e+00 : f32
    %50 = vector.broadcast %cst_21 : f32 to vector<1x128xf32>
    %51 = arith.maximumf %49, %50 : vector<1x128xf32>
    %c3 = arith.constant 3 : index
    %c0_22 = arith.constant 0 : index
    %52 = memref.load %arg1[%c3, %c0_22] : memref<4x3xf32, #tpu.memory_space<smem>>
    %53 = vector.broadcast %52 : f32 to vector<1x128xf32>
    %54 = arith.mulf %1, %53 : vector<1x128xf32>
    %c3_23 = arith.constant 3 : index
    %55 = memref.load %arg2[%c3_23] : memref<4xf32, #tpu.memory_space<smem>>
    %56 = vector.broadcast %55 : f32 to vector<1x128xf32>
    %57 = arith.addf %54, %56 : vector<1x128xf32>
    %c3_24 = arith.constant 3 : index
    %c1_25 = arith.constant 1 : index
    %58 = memref.load %arg1[%c3_24, %c1_25] : memref<4x3xf32, #tpu.memory_space<smem>>
    %59 = vector.broadcast %58 : f32 to vector<1x128xf32>
    %60 = arith.mulf %2, %59 : vector<1x128xf32>
    %61 = arith.addf %57, %60 : vector<1x128xf32>
    %c3_26 = arith.constant 3 : index
    %c2_27 = arith.constant 2 : index
    %62 = memref.load %arg1[%c3_26, %c2_27] : memref<4x3xf32, #tpu.memory_space<smem>>
    %63 = vector.broadcast %62 : f32 to vector<1x128xf32>
    %64 = arith.mulf %3, %63 : vector<1x128xf32>
    %65 = arith.addf %61, %64 : vector<1x128xf32>
    %cst_28 = arith.constant 0.000000e+00 : f32
    %66 = vector.broadcast %cst_28 : f32 to vector<1x128xf32>
    %67 = arith.maximumf %65, %66 : vector<1x128xf32>
    %c0_29 = arith.constant 0 : index
    %c0_30 = arith.constant 0 : index
    %68 = memref.load %arg3[%c0_29, %c0_30] : memref<3x4xf32, #tpu.memory_space<smem>>
    %69 = vector.broadcast %68 : f32 to vector<1x128xf32>
    %70 = arith.mulf %19, %69 : vector<1x128xf32>
    %c0_31 = arith.constant 0 : index
    %71 = memref.load %arg4[%c0_31] : memref<3xf32, #tpu.memory_space<smem>>
    %72 = vector.broadcast %71 : f32 to vector<1x128xf32>
    %73 = arith.addf %70, %72 : vector<1x128xf32>
    %c0_32 = arith.constant 0 : index
    %c1_33 = arith.constant 1 : index
    %74 = memref.load %arg3[%c0_32, %c1_33] : memref<3x4xf32, #tpu.memory_space<smem>>
    %75 = vector.broadcast %74 : f32 to vector<1x128xf32>
    %76 = arith.mulf %35, %75 : vector<1x128xf32>
    %77 = arith.addf %73, %76 : vector<1x128xf32>
    %c0_34 = arith.constant 0 : index
    %c2_35 = arith.constant 2 : index
    %78 = memref.load %arg3[%c0_34, %c2_35] : memref<3x4xf32, #tpu.memory_space<smem>>
    %79 = vector.broadcast %78 : f32 to vector<1x128xf32>
    %80 = arith.mulf %51, %79 : vector<1x128xf32>
    %81 = arith.addf %77, %80 : vector<1x128xf32>
    %c0_36 = arith.constant 0 : index
    %c3_37 = arith.constant 3 : index
    %82 = memref.load %arg3[%c0_36, %c3_37] : memref<3x4xf32, #tpu.memory_space<smem>>
    %83 = vector.broadcast %82 : f32 to vector<1x128xf32>
    %84 = arith.mulf %67, %83 : vector<1x128xf32>
    %85 = arith.addf %81, %84 : vector<1x128xf32>
    %c1_38 = arith.constant 1 : index
    %c0_39 = arith.constant 0 : index
    %86 = memref.load %arg3[%c1_38, %c0_39] : memref<3x4xf32, #tpu.memory_space<smem>>
    %87 = vector.broadcast %86 : f32 to vector<1x128xf32>
    %88 = arith.mulf %19, %87 : vector<1x128xf32>
    %c1_40 = arith.constant 1 : index
    %89 = memref.load %arg4[%c1_40] : memref<3xf32, #tpu.memory_space<smem>>
    %90 = vector.broadcast %89 : f32 to vector<1x128xf32>
    %91 = arith.addf %88, %90 : vector<1x128xf32>
    %c1_41 = arith.constant 1 : index
    %c1_42 = arith.constant 1 : index
    %92 = memref.load %arg3[%c1_41, %c1_42] : memref<3x4xf32, #tpu.memory_space<smem>>
    %93 = vector.broadcast %92 : f32 to vector<1x128xf32>
    %94 = arith.mulf %35, %93 : vector<1x128xf32>
    %95 = arith.addf %91, %94 : vector<1x128xf32>
    %c1_43 = arith.constant 1 : index
    %c2_44 = arith.constant 2 : index
    %96 = memref.load %arg3[%c1_43, %c2_44] : memref<3x4xf32, #tpu.memory_space<smem>>
    %97 = vector.broadcast %96 : f32 to vector<1x128xf32>
    %98 = arith.mulf %51, %97 : vector<1x128xf32>
    %99 = arith.addf %95, %98 : vector<1x128xf32>
    %c1_45 = arith.constant 1 : index
    %c3_46 = arith.constant 3 : index
    %100 = memref.load %arg3[%c1_45, %c3_46] : memref<3x4xf32, #tpu.memory_space<smem>>
    %101 = vector.broadcast %100 : f32 to vector<1x128xf32>
    %102 = arith.mulf %67, %101 : vector<1x128xf32>
    %103 = arith.addf %99, %102 : vector<1x128xf32>
    %c2_47 = arith.constant 2 : index
    %c0_48 = arith.constant 0 : index
    %104 = memref.load %arg3[%c2_47, %c0_48] : memref<3x4xf32, #tpu.memory_space<smem>>
    %105 = vector.broadcast %104 : f32 to vector<1x128xf32>
    %106 = arith.mulf %19, %105 : vector<1x128xf32>
    %c2_49 = arith.constant 2 : index
    %107 = memref.load %arg4[%c2_49] : memref<3xf32, #tpu.memory_space<smem>>
    %108 = vector.broadcast %107 : f32 to vector<1x128xf32>
    %109 = arith.addf %106, %108 : vector<1x128xf32>
    %c2_50 = arith.constant 2 : index
    %c1_51 = arith.constant 1 : index
    %110 = memref.load %arg3[%c2_50, %c1_51] : memref<3x4xf32, #tpu.memory_space<smem>>
    %111 = vector.broadcast %110 : f32 to vector<1x128xf32>
    %112 = arith.mulf %35, %111 : vector<1x128xf32>
    %113 = arith.addf %109, %112 : vector<1x128xf32>
    %c2_52 = arith.constant 2 : index
    %c2_53 = arith.constant 2 : index
    %114 = memref.load %arg3[%c2_52, %c2_53] : memref<3x4xf32, #tpu.memory_space<smem>>
    %115 = vector.broadcast %114 : f32 to vector<1x128xf32>
    %116 = arith.mulf %51, %115 : vector<1x128xf32>
    %117 = arith.addf %113, %116 : vector<1x128xf32>
    %c2_54 = arith.constant 2 : index
    %c3_55 = arith.constant 3 : index
    %118 = memref.load %arg3[%c2_54, %c3_55] : memref<3x4xf32, #tpu.memory_space<smem>>
    %119 = vector.broadcast %118 : f32 to vector<1x128xf32>
    %120 = arith.mulf %67, %119 : vector<1x128xf32>
    %121 = arith.addf %117, %120 : vector<1x128xf32>
    %122 = arith.maximumf %85, %103 : vector<1x128xf32>
    %123 = arith.maximumf %122, %121 : vector<1x128xf32>
    %124 = arith.subf %85, %123 : vector<1x128xf32>
    %125 = math.exp %124 : vector<1x128xf32>
    %126 = arith.subf %103, %123 : vector<1x128xf32>
    %127 = math.exp %126 : vector<1x128xf32>
    %128 = arith.subf %121, %123 : vector<1x128xf32>
    %129 = math.exp %128 : vector<1x128xf32>
    %130 = arith.addf %125, %127 : vector<1x128xf32>
    %131 = arith.addf %130, %129 : vector<1x128xf32>
    %132 = tpu.reciprocal %131 : vector<1x128xf32> -> vector<1x128xf32>
    %133 = arith.mulf %125, %132 : vector<1x128xf32>
    %134 = arith.mulf %127, %132 : vector<1x128xf32>
    %135 = arith.mulf %129, %132 : vector<1x128xf32>
    %136 = tpu.concatenate %133, %134, %135 in 0 : vector<1x128xf32>, vector<1x128xf32>, vector<1x128xf32> -> vector<3x128xf32>
    %c0_56 = arith.constant 0 : index
    %c0_57 = arith.constant 0 : index
    %137 = vector.load %arg5[%c0_56, %c0_57] : memref<3x128xf32, #tpu.memory_space<vmem>>, vector<3x128xf32>
    tpu.vector_store %arg5[%c0_56, %c0_57], %136 {strides = array<i32>} : memref<3x128xf32, #tpu.memory_space<vmem>>, vector<3x128xf32>,
    return
  }
}

</mosaic_0001>

<bundles_post_ra>
// kernel: simple_model_forward.2
= control target key start
LH: loop header
LB: loop body
LE: loop exit
PB: predicated region body
PF: predicated region fallthrough
CT: control target
= control target key end

     0   :  { %s511_s0 = inlined_call_operand.vmem [shape: f32[4,3], index: 0, kind: input, shape index: {}]   ;;  %s512_s1 = inlined_call_operand.vmem [shape: f32[4], index: 1, kind: input, shape index: {}]   ;;  %s513_s2 = inlined_call_operand.vmem [shape: f32[3,4], index: 2, kind: input, shape index: {}]   ;;  %s514_s3 = inlined_call_operand.vmem [shape: f32[3], index: 3, kind: input, shape index: {}]   ;;  %s515_s4 = inlined_call_operand.vmem [shape: f32[3,100], index: 4, kind: input, shape index: {}]   ;;  %s516_s5 = inlined_call_operand.<no memory space> [shape: f32[], index: 5, kind: input, shape index: {}]   ;;  %s517_s6 = inlined_call_operand.vmem [shape: f32[3,128], index: 6, kind: output, shape index: {}]  }
   0x1   :  { %v11_v0 = vstv %s516_s5 }
   0x2   :  { %12 = vsyncpa [#allocation8], 0 }
   0x3   :  { %13 = vsyncpa [#allocation10], 0  ;;  %s33_s25 = sshll.u32 %s512_s1, 4  ;;  %s34_s25 = int_to_ptr.vmem [resolvable:$true] %s33_s25 }
   0x4   :  { %14 = vsyncpa [#allocation13], 0  ;;  %s23_s28 = sshll.u32 %s511_s0, 4  ;;  %s296_s29 = scalar_lea.vmem %s34_s25, 16  ;;  %s24_s28 = int_to_ptr.vmem [resolvable:$true] %s23_s28 }
   0x5   :  { %p297_p0 = scmp.ne.s32.totalorder %s34_s25, %s296_s29  ;;  %p301_p1 = scmp.lt.s32.totalorder %s34_s25, %s34_s25 }
   0x6   :  { %p302_p2 = scmp.lt.s32.totalorder %s296_s29, %s296_s29 }
   0x8   :  { %p303_p3 = por %p302_p2, %p301_p1 }
   0xa   :  { %p304_p4 = pnand %p303_p3, %p297_p0 }
   0xc   :  { %307 = shalt.err (!%p304_p4)
}
   0xd   :  { %s350_s30 = smov [#allocation9]   ;;  %s308_s7 = scalar_lea.vmem %s24_s28, 64 }
   0xe   :  { %36 = dma.vmem_to_smem %s34_s25, 16, %s350_s30, [#allocation10]  }
   0xf   :  { %p309_p5 = scmp.ne.s32.totalorder %s24_s28, %s308_s7  ;;  %p313_p6 = scmp.lt.s32.totalorder %s24_s28, %s24_s28 }
  0x10   :  { %p314_p7 = scmp.lt.s32.totalorder %s308_s7, %s308_s7 }
  0x12   :  { %p315_p8 = por %p314_p7, %p313_p6 }
  0x14   :  { %p316_p9 = pnand %p315_p8, %p309_p5 }
  0x16   :  { %319 = shalt.err (!%p316_p9)
}
  0x17   :  { %s351_s1 = smov [#allocation7]   ;;  %s43_s9 = sshll.u32 %s513_s2, 4  ;;  %s44_s9 = int_to_ptr.vmem [resolvable:$true] %s43_s9 }
  0x18   :  { %26 = dma.vmem_to_smem %s24_s28, 64, %s351_s1, [#allocation8]  }
  0x19   :  { %s53_s12 = sshll.u32 %s514_s3, 4  ;;  %s320_s13 = scalar_lea.vmem %s44_s9, 64  ;;  %s54_s12 = int_to_ptr.vmem [resolvable:$true] %s53_s12 }
  0x1a   :  { %p321_p10 = scmp.ne.s32.totalorder %s44_s9, %s320_s13  ;;  %p325_p11 = scmp.lt.s32.totalorder %s44_s9, %s44_s9 }
  0x1b   :  { %p326_p12 = scmp.lt.s32.totalorder %s320_s13, %s320_s13 }
  0x1d   :  { %p327_p13 = por %p326_p12, %p325_p11 }
  0x1f   :  { %p328_p0 = pnand %p327_p13, %p321_p10 }
  0x21   :  { %331 = shalt.err (!%p328_p0)
}
  0x22   :  { %s352_s14 = smov [#allocation11]   ;;  %s332_s15 = scalar_lea.vmem %s54_s12, 16 }
  0x23   :  { %46 = dma.vmem_to_smem %s44_s9, 64, %s352_s14, [#allocation10]  }
  0x24   :  { %p333_p1 = scmp.ne.s32.totalorder %s54_s12, %s332_s15  ;;  %p337_p2 = scmp.lt.s32.totalorder %s54_s12, %s54_s12 }
  0x25   :  { %p338_p3 = scmp.lt.s32.totalorder %s332_s15, %s332_s15 }
  0x27   :  { %p339_p4 = por %p338_p3, %p337_p2 }
  0x29   :  { %p340_p5 = pnand %p339_p4, %p333_p1 }
  0x2b   :  { %343 = shalt.err (!%p340_p5)
}
  0x2c   :  { %s353_s2 = smov [#allocation12]  }
  0x2d   :  { %56 = dma.vmem_to_smem %s54_s12, 16, %s353_s2, [#allocation13]  }
  0x2e   :  { %344 = dma.done.wait [#allocation8], 64  }
  0x2f   :  { %345 = vsyncadd [#allocation8], 4294967232 }
  0x30   :  { %346 = dma.done.wait [#allocation10], 80  }
  0x31   :  { %347 = vsyncadd [#allocation10], 4294967216 }
  0x32   :  { %348 = dma.done.wait [#allocation13], 16  }
  0x33   :  { %349 = vsyncadd [#allocation13], 4294967280 }
  0x34   :  { %69 = sfence }
  0x35   :  { %v71_v1 = vlaneseq  ;;  %s404_s3 = sld [smem:[#allocation7]]  ;;  %v70_v2 = vld [vmem:[%s515_s4] sm:$0x7]  ;;  %s411_s19 = sld [smem:[#allocation7 + $0x1]]  ;;  %vm245_vm2 = vcmask 1040384   ;;  %vm247_vm3 = vcmask 1041408  }
  0x36   :  { %s406_s16 = sld [smem:[#allocation9]]  ;;  %s413_s20 = sld [smem:[#allocation7 + $0x2]] }
  0x37   :  { %v72_v3 = vshrl.u32 %v71_v1, 7  ;;  %v77_v4 = vand.u32 127, %v71_v1  ;;  %s415_s21 = sld [smem:[#allocation7 + $0x80]]  ;;  %s417_s22 = sld [smem:[#allocation9 + $0x1]] }
  0x38   :  { %s419_s23 = sld [smem:[#allocation7 + $0x81]]  ;;  %s421_s24 = sld [smem:[#allocation7 + $0x82]] }
  0x39   :  { %vm74_vm0 = vcmp.lt.s32.totalorder %v72_v3, 3  ;;  %vm79_vm1 = vcmp.lt.s32.totalorder %v77_v4, 100  ;;  %s423_s4 = sld [smem:[#allocation7 + $0x100]]  ;;  %s425_s25 = sld [smem:[#allocation9 + $0x2]] }
  0x3a   :  { %v75_v5 = vsel %vm74_vm0, %v70_v2, %v11_v0  ;;  %s431_s28 = sld [smem:[#allocation7 + $0x101]]  ;;  %s433_s29 = sld [smem:[#allocation7 + $0x102]] }
  0x3b   :  { %v80_v6 = vsel %vm79_vm1, %v75_v5, %v11_v0  ;;  %s439_s1 = sld [smem:[#allocation7 + $0x180]]  ;;  %s441_s0 = sld [smem:[#allocation9 + $0x3]]  ;;  %v85_v7 = vstv %s404_s3  ;;  %v91_v9 = vstv %s411_s19 }
  0x3c   :  { %82 = vst [vmem:[#allocation14] sm:$0xf] %v80_v6  ;;  %s443_s8 = sld [smem:[#allocation7 + $0x181]]  ;;  %s445_s9 = sld [smem:[#allocation7 + $0x182]]  ;;  %v88_v8 = vstv %s406_s16  ;;  %v98_v10 = vstv %s413_s20 }
  0x3d   :  { %s447_s10 = sld [smem:[#allocation11]]  ;;  %v106_v11 = vstv %s415_s21  ;;  %v109_v12 = vstv %s417_s22  ;;  %s461_s11 = sld [smem:[#allocation11 + $0x1]] }
  0x3e   :  { %s449_s5 = sld [smem:[#allocation12]]  ;;  %v112_v13 = vstv %s419_s23  ;;  %v119_v14 = vstv %s421_s24  ;;  %s471_s12 = sld [smem:[#allocation11 + $0x2]] }
  0x3f   :  { %v127_v15 = vstv %s423_s4  ;;  %v130_v16 = vstv %s425_s25  ;;  %s473_s13 = sld [smem:[#allocation11 + $0x3]]  ;;  %s475_s14 = sld [smem:[#allocation11 + $0x80]] }
  0x40   :  { %v133_v17 = vstv %s431_s28  ;;  %v140_v18 = vstv %s433_s29  ;;  %s477_s15 = sld [smem:[#allocation12 + $0x1]]  ;;  %s481_s3 = sld [smem:[#allocation11 + $0x82]] }
  0x41   :  { %v148_v19 = vstv %s439_s1  ;;  %v151_v20 = vstv %s441_s0  ;;  %s479_s2 = sld [smem:[#allocation11 + $0x81]]  ;;  %s483_s16 = sld [smem:[#allocation11 + $0x83]] }
  0x42   :  { %v154_v22 = vstv %s443_s8  ;;  %v161_v23 = vstv %s445_s9  ;;  %s485_s17 = sld [smem:[#allocation11 + $0x100]]  ;;  %s488_s18 = sld [smem:[#allocation12 + $0x2]] }
  0x43   :  { %v83_v21 = vld [vmem:[#allocation14] sm:$0x7]  ;;  %v169_v24 = vstv %s447_s10  ;;  %v175_v49 = vstv %s461_s11  ;;  %s490_s19 = sld [smem:[#allocation11 + $0x101]]  ;;  %s494_s20 = sld [smem:[#allocation11 + $0x102]] }
  0x44   :  { %v172_v25 = vstv %s449_s5  ;;  %v86_v26 = vmul.f32 %v85_v7, %v83_v21  ;;  %v92_v27 = vmul.f32 %v91_v9, %v83_v21  ;;  %v99_v28 = vmul.f32 %v98_v10, %v83_v21  ;;  %s496_s21 = sld [smem:[#allocation11 + $0x103]] }
  0x45   :  { %v107_v29 = vmul.f32 %v106_v11, %v83_v21  ;;  %v113_v30 = vmul.f32 %v112_v13, %v83_v21  ;;  %v120_v31 = vmul.f32 %v119_v14, %v83_v21  ;;  %v128_v32 = vmul.f32 %v127_v15, %v83_v21 }
  0x46   :  { %v134_v33 = vmul.f32 %v133_v17, %v83_v21  ;;  %v89_v34 = vadd.f32 %v88_v8, %v86_v26  ;;  %v94_v35 = vrot.slane %v92_v27, 1  ;;  %v101_v36 = vrot.slane %v99_v28, 2 }
  0x47   :  { %v110_v37 = vadd.f32 %v109_v12, %v107_v29  ;;  %v115_v38 = vrot.slane %v113_v30, 1  ;;  %v122_v39 = vrot.slane %v120_v31, 2  ;;  %v131_v40 = vadd.f32 %v130_v16, %v128_v32 }
  0x48   :  { %v136_v41 = vrot.slane %v134_v33, 1  ;;  %v96_v42 = vadd.f32 %v94_v35, %v89_v34  ;;  %v141_v43 = vmul.f32 %v140_v18, %v83_v21  ;;  %v149_v44 = vmul.f32 %v148_v19, %v83_v21 }
  0x49   :  { %v155_v45 = vmul.f32 %v154_v22, %v83_v21  ;;  %v117_v46 = vadd.f32 %v115_v38, %v110_v37  ;;  %v162_v48 = vmul.f32 %v161_v23, %v83_v21  ;;  %v179_v56 = vstv %s471_s12 }
  0x4a   :  { %v138_v47 = vadd.f32 %v136_v41, %v131_v40  ;;  %v103_v50 = vadd.f32 %v101_v36, %v96_v42  ;;  %v143_v51 = vrot.slane %v141_v43, 2  ;;  %v152_v52 = vadd.f32 %v151_v20, %v149_v44 }
  0x4b   :  { %v157_v53 = vrot.slane %v155_v45, 1  ;;  %v124_v54 = vadd.f32 %v122_v39, %v117_v46  ;;  %v164_v55 = vrot.slane %v162_v48, 2  ;;  %v183_v57 = vstv %s473_s13 }
  0x4c   :  { %v104_v58 = vmax.f32 %v103_v50, 0.0  ;;  %v145_v59 = vadd.f32 %v143_v51, %v138_v47  ;;  %v187_v61 = vstv %s475_s14  ;;  %v190_v63 = vstv %s477_s15 }
  0x4d   :  { %v159_v60 = vadd.f32 %v157_v53, %v152_v52  ;;  %v125_v62 = vmax.f32 %v124_v54, 0.0  ;;  %v193_v0 = vstv %s479_s2  ;;  %v197_v1 = vstv %s481_s3 }
  0x4e   :  { %v146_v2 = vmax.f32 %v145_v59, 0.0  ;;  %v170_v4 = vmul.f32 %v169_v24, %v104_v58  ;;  %v188_v5 = vmul.f32 %v187_v61, %v104_v58  ;;  %v201_v8 = vstv %s483_s16 }
  0x4f   :  { %v166_v3 = vadd.f32 %v164_v55, %v159_v60  ;;  %v176_v6 = vmul.f32 %v175_v49, %v125_v62  ;;  %v194_v7 = vmul.f32 %v193_v0, %v125_v62  ;;  %v205_v9 = vstv %s485_s17 }
  0x50   :  { %v173_v11 = vadd.f32 %v172_v25, %v170_v4  ;;  %v180_v12 = vmul.f32 %v179_v56, %v146_v2  ;;  %v191_v13 = vadd.f32 %v190_v63, %v188_v5  ;;  %v198_v14 = vmul.f32 %v197_v1, %v146_v2 }
  0x51   :  { %v167_v10 = vmax.f32 %v166_v3, 0.0  ;;  %v206_v15 = vmul.f32 %v205_v9, %v104_v58  ;;  %v208_v16 = vstv %s488_s18  ;;  %v211_v17 = vstv %s490_s19 }
  0x52   :  { %v177_v18 = vadd.f32 %v176_v6, %v173_v11  ;;  %v195_v20 = vadd.f32 %v194_v7, %v191_v13  ;;  %v212_v23 = vmul.f32 %v211_v17, %v125_v62  ;;  %v215_v24 = vstv %s494_s20 }
  0x53   :  { %v184_v19 = vmul.f32 %v183_v57, %v167_v10  ;;  %v202_v21 = vmul.f32 %v201_v8, %v167_v10  ;;  %v209_v22 = vadd.f32 %v208_v16, %v206_v15  ;;  %v219_v26 = vstv %s496_s21 }
  0x54   :  { %v181_v27 = vadd.f32 %v180_v12, %v177_v18  ;;  %v199_v28 = vadd.f32 %v198_v14, %v195_v20  ;;  %v216_v29 = vmul.f32 %v215_v24, %v146_v2  ;;  %v220_v31 = vmul.f32 %v219_v26, %v167_v10 }
  0x55   :  { %v213_v30 = vadd.f32 %v212_v23, %v209_v22 }
  0x56   :  { %v185_v25 = vadd.f32 %v184_v19, %v181_v27  ;;  %v203_v32 = vadd.f32 %v202_v21, %v199_v28 }
  0x57   :  { %v217_v33 = vadd.f32 %v216_v29, %v213_v30 }
  0x58   :  { %v222_v34 = vmax.f32 %v185_v25, %v203_v32 }
  0x59   :  { %v221_v35 = vadd.f32 %v220_v31, %v217_v33 }
  0x5b   :  { %v223_v36 = vmax.f32 %v222_v34, %v221_v35 }
  0x5d   :  { %v224_v37 = vsub.f32 %v185_v25, %v223_v36  ;;  %v227_v38 = vsub.f32 %v203_v32, %v223_v36  ;;  %v230_v39 = vsub.f32 %v221_v35, %v223_v36 }
  0x5f   :  { %v225_v40 = vmul.f32 1.442695, %v224_v37  ;;  %v228_v41 = vmul.f32 1.442695, %v227_v38  ;;  %v231_v42 = vmul.f32 1.442695, %v230_v39 }
  0x61   :  { %288 = vpow2.f32 %v225_v40 }
  0x62   :  { %290 = vpow2.f32 %v228_v41 }
  0x63   :  { %292 = vpow2.f32 %v231_v42 }
  0x6b   :  { %v289_v43 = vpop.eup %288 }
  0x6c   :  { %v291_v44 = vpop.eup %290 }
  0x6d   :  { %v293_v45 = vpop.eup %292  ;;  %v233_v46 = vadd.f32 %v291_v44, %v289_v43 }
  0x6f   :  { %v234_v47 = vadd.f32 %v293_v45, %v233_v46 }
  0x71   :  { %294 = vrcp.f32 %v234_v47 }
  0x7b   :  { %v295_v48 = vpop.eup %294 }
  0x7c   :  { %v236_v49 = vmul.f32 %v295_v48, %v289_v43  ;;  %v237_v50 = vmul.f32 %v295_v48, %v291_v44  ;;  %v238_v51 = vmul.f32 %v295_v48, %v293_v45 }
  0x7e   :  { %v240_v52 = vrot.slane %v237_v50, 7  ;;  %v243_v53 = vrot.slane %v238_v51, 6 }
  0x80   :  { %v246_v54 = vsel %vm245_vm2, %v236_v49, %v240_v52 }
  0x81   :  { %v248_v55 = vsel %vm247_vm3, %v246_v54, %v243_v53 }
  0x82   :  { %249 = vst [vmem:[%s517_s6] sm:$0x7] %v248_v55 }
  0x83   :  { %254 = vsyncpa [#allocation8], 1 }
  0x84   :  { %255 = vsyncpa [#allocation10], 1 }
  0x85   :  { %256 = vsyncpa [#allocation13], 1 }

</bundles_post_ra>
